<compile_context>
chip_gen: v7x
topology: tpu7x:2x2x1
jax: 0.10.0
libtpu: 0.0.40
codegen_flags: <defaults>
</compile_context>

<pallas_src>
import math

import jax
import jax.numpy as jnp
from jax import lax
from jax.experimental import pallas as pl
from jax.experimental.pallas import tpu as pltpu

# ---- "Config" (PyTorch Config.d_model / Config.n_heads) ----
D_MODEL = 32
N_HEADS = 4
D_K = D_MODEL // N_HEADS   # 8
D_V = D_MODEL // N_HEADS   # 8

B = 2            # batch
S = 8            # sequence length
BS = B * S       # flattened (batch * seq) rows


def mha_kernel(xq_ref, xk_ref, xv_ref, bias_ref,
               wq_ref, bq_ref, wk_ref, bk_ref, wv_ref, bv_ref,
               wo_ref, bo_ref,
               out_ref):
    f32 = jnp.float32
    bf16 = jnp.bfloat16

    # Cast matmul operands to bf16 once; f32 accumulation everywhere.
    xq = xq_ref[...].astype(bf16)
    xk = xk_ref[...].astype(bf16)
    xv = xv_ref[...].astype(bf16)
    wq = wq_ref[...].astype(bf16)
    wk = wk_ref[...].astype(bf16)
    wv = wv_ref[...].astype(bf16)
    wo = wo_ref[...].astype(bf16)

    bias = bias_ref[...]                                       # (BS, BS) f32 additive mask

    scale = 1.0 / math.sqrt(D_K)
    # Pre-scale Q (equivalent to scaling scores) -> no per-head score multiply.
    q_all = (jnp.dot(xq, wq, preferred_element_type=f32) + bq_ref[...]) * scale
    k_all = jnp.dot(xk, wk, preferred_element_type=f32) + bk_ref[...]
    v_all = jnp.dot(xv, wv, preferred_element_type=f32) + bv_ref[...]

    qb = q_all.astype(bf16)
    kb = k_all.astype(bf16)
    vb = v_all.astype(bf16)

    # Contract d_k of BOTH operands: q @ k.T without materializing k.T.
    dn = (((1,), (1,)), ((), ()))

    acc = jnp.zeros((BS, D_MODEL), dtype=f32)
    for h in range(N_HEADS):                                   # static 4-way unroll
        qh = qb[:, h * D_K:(h + 1) * D_K]                      # (BS, d_k)
        kh = kb[:, h * D_K:(h + 1) * D_K]                      # (BS, d_k)
        vh = vb[:, h * D_V:(h + 1) * D_V]                      # (BS, d_v)
        wo_h = wo[h * D_V:(h + 1) * D_V, :]                    # (d_v, D)

        s = lax.dot_general(qh, kh, dimension_numbers=dn,
                            preferred_element_type=f32)        # (BS, BS)
        s = s + bias                                           # hoisted additive mask

        # numerically-stable softmax in f32
        m = jnp.max(s, axis=-1, keepdims=True)
        p = jnp.exp(s - m)
        denom = jnp.sum(p, axis=-1, keepdims=True)
        att = p * pl.reciprocal(denom, approx=True)            # EUP reciprocal, not divide

        z = jnp.dot(att.astype(bf16), vh, preferred_element_type=f32)       # (BS, d_v)
        # per-head output projection accumulated -> no lane-axis concat
        acc = acc + jnp.dot(z.astype(bf16), wo_h, preferred_element_type=f32)

    out_ref[...] = (acc + bo_ref[...]).astype(out_ref.dtype)


def multi_head_attention(xq, xk, xv, mask_bool, params):
    """xq/xk/xv: (B, S, D) f32.  mask_bool: (B, S, S) bool (True = masked)."""
    wq, bq, wk, bk, wv, bv, wo, bo = params

    # Flatten batch into the row axis (single kernel invocation, no grid).
    xq2 = xq.reshape(BS, D_MODEL)
    xk2 = xk.reshape(BS, D_MODEL)
    xv2 = xv.reshape(BS, D_MODEL)

    # Block-diagonal additive mask: -1e9 across batches or where att_mask is True.
    eye = jnp.eye(B, dtype=bool)                               # (B, B)
    m4 = jnp.where(eye[:, None, :, None], mask_bool[:, :, None, :], True)  # (B,S,B,S)
    bias = jnp.where(m4.reshape(BS, BS), jnp.float32(-1e9), jnp.float32(0.0))

    vmem = lambda: pl.BlockSpec(memory_space=pltpu.MemorySpace.VMEM)

    out2 = pl.pallas_call(
        mha_kernel,
        out_shape=jax.ShapeDtypeStruct((BS, D_MODEL), jnp.float32),
        in_specs=[vmem() for _ in range(12)],
        out_specs=vmem(),
    )(xq2, xk2, xv2, bias, wq, bq, wk, bk, wv, bv, wo, bo)

    return out2.reshape(B, S, D_MODEL)


def mha_reference(xq, xk, xv, mask_bool, params):
    """Plain-JAX f32 reference mirroring the PyTorch forward."""
    wq, bq, wk, bk, wv, bv, wo, bo = params
    Q = xq @ wq + bq
    K = xk @ wk + bk
    V = xv @ wv + bv
    Q = Q.reshape(B, S, N_HEADS, D_K).transpose(0, 2, 1, 3)
    K = K.reshape(B, S, N_HEADS, D_K).transpose(0, 2, 1, 3)
    V = V.reshape(B, S, N_HEADS, D_V).transpose(0, 2, 1, 3)
    score = jnp.einsum("bhqd,bhkd->bhqk", Q, K) / math.sqrt(D_K)
    score = jnp.where(mask_bool[:, None, :, :], -1e9, score)
    att = jax.nn.softmax(score, axis=-1)
    z = jnp.einsum("bhqk,bhkd->bhqd", att, V)
    z = z.transpose(0, 2, 1, 3).reshape(B, S, N_HEADS * D_V)
    return z @ wo + bo


def init_params(key):
    ks = jax.random.split(key, 8)
    def lin(kw, kb, fan_in, fan_out):
        bound = 1.0 / math.sqrt(fan_in)
        w = jax.random.uniform(kw, (fan_in, fan_out), jnp.float32, -bound, bound)
        b = jax.random.uniform(kb, (1, fan_out), jnp.float32, -bound, bound)
        return w, b
    wq, bq = lin(ks[0], ks[1], D_MODEL, N_HEADS * D_K)
    wk, bk = lin(ks[2], ks[3], D_MODEL, N_HEADS * D_K)
    wv, bv = lin(ks[4], ks[5], D_MODEL, N_HEADS * D_V)
    wo, bo = lin(ks[6], ks[7], N_HEADS * D_V, D_MODEL)
    return (wq, bq, wk, bk, wv, bv, wo, bo)


if __name__ == "__main__":
    key = jax.random.PRNGKey(0)
    kx, kq, kk, kv = jax.random.split(key, 4)

    params = init_params(kx)
    input_Q = jax.random.normal(kq, (B, S, D_MODEL), jnp.float32)
    input_K = jax.random.normal(kk, (B, S, D_MODEL), jnp.float32)
    input_V = jax.random.normal(kv, (B, S, D_MODEL), jnp.float32)

    # padding-style mask: batch 0 has full length 8, batch 1 has valid length 6
    valid_len = jnp.array([8, 6])
    key_pos = jnp.arange(S)
    att_mask = key_pos[None, None, :] >= valid_len[:, None, None]   # (B, 1, S)
    att_mask = jnp.broadcast_to(att_mask, (B, S, S))                # (B, S, S) bool

    out = multi_head_attention(input_Q, input_K, input_V, att_mask, params)
    out = jax.block_until_ready(out)

    ref = mha_reference(input_Q, input_K, input_V, att_mask, params)
    assert out.shape == (B, S, D_MODEL)
    # bf16 MXU operands + approx reciprocal -> relaxed tolerance vs the f32 reference
    assert jnp.allclose(out, ref, atol=5e-2, rtol=5e-2), "mismatch vs reference"

    print("KERNEL_OK")
</pallas_src>

<mosaic_0001>
module attributes {stable_mosaic.version = 11 : i64} {
  func.func @mha_kernel(%arg0: memref<16x32xf32, #tpu.memory_space<vmem>>, %arg1: memref<16x32xf32, #tpu.memory_space<vmem>>, %arg2: memref<16x32xf32, #tpu.memory_space<vmem>>, %arg3: memref<16x16xf32, #tpu.memory_space<vmem>>, %arg4: memref<32x32xf32, #tpu.memory_space<vmem>>, %arg5: memref<1x32xf32, #tpu.memory_space<vmem>>, %arg6: memref<32x32xf32, #tpu.memory_space<vmem>>, %arg7: memref<1x32xf32, #tpu.memory_space<vmem>>, %arg8: memref<32x32xf32, #tpu.memory_space<vmem>>, %arg9: memref<1x32xf32, #tpu.memory_space<vmem>>, %arg10: memref<32x32xf32, #tpu.memory_space<vmem>>, %arg11: memref<1x32xf32, #tpu.memory_space<vmem>>, %arg12: memref<16x32xf32, #tpu.memory_space<vmem>>) attributes {dimension_semantics = [], scalar_prefetch = 0 : i64, scratch_operands = 0 : i64, tpu.core_type = #tpu.core_type<tc>} {
    %c0 = arith.constant 0 : index
    %c0_0 = arith.constant 0 : index
    %0 = vector.load %arg0[%c0, %c0_0] : memref<16x32xf32, #tpu.memory_space<vmem>>, vector<16x32xf32>
    %1 = arith.truncf %0 : vector<16x32xf32> to vector<16x32xbf16>
    %c0_1 = arith.constant 0 : index
    %c0_2 = arith.constant 0 : index
    %2 = vector.load %arg1[%c0_1, %c0_2] : memref<16x32xf32, #tpu.memory_space<vmem>>, vector<16x32xf32>
    %3 = arith.truncf %2 : vector<16x32xf32> to vector<16x32xbf16>
    %c0_3 = arith.constant 0 : index
    %c0_4 = arith.constant 0 : index
    %4 = vector.load %arg2[%c0_3, %c0_4] : memref<16x32xf32, #tpu.memory_space<vmem>>, vector<16x32xf32>
    %5 = arith.truncf %4 : vector<16x32xf32> to vector<16x32xbf16>
    %c0_5 = arith.constant 0 : index
    %c0_6 = arith.constant 0 : index
    %6 = vector.load %arg4[%c0_5, %c0_6] : memref<32x32xf32, #tpu.memory_space<vmem>>, vector<32x32xf32>
    %7 = arith.truncf %6 : vector<32x32xf32> to vector<32x32xbf16>
    %c0_7 = arith.constant 0 : index
    %c0_8 = arith.constant 0 : index
    %8 = vector.load %arg6[%c0_7, %c0_8] : memref<32x32xf32, #tpu.memory_space<vmem>>, vector<32x32xf32>
    %9 = arith.truncf %8 : vector<32x32xf32> to vector<32x32xbf16>
    %c0_9 = arith.constant 0 : index
    %c0_10 = arith.constant 0 : index
    %10 = vector.load %arg8[%c0_9, %c0_10] : memref<32x32xf32, #tpu.memory_space<vmem>>, vector<32x32xf32>
    %11 = arith.truncf %10 : vector<32x32xf32> to vector<32x32xbf16>
    %c0_11 = arith.constant 0 : index
    %c0_12 = arith.constant 0 : index
    %12 = vector.load %arg10[%c0_11, %c0_12] : memref<32x32xf32, #tpu.memory_space<vmem>>, vector<32x32xf32>
    %13 = arith.truncf %12 : vector<32x32xf32> to vector<32x32xbf16>
    %c0_13 = arith.constant 0 : index
    %c0_14 = arith.constant 0 : index
    %14 = vector.load %arg3[%c0_13, %c0_14] : memref<16x16xf32, #tpu.memory_space<vmem>>, vector<16x16xf32>
    %cst = arith.constant dense<0.000000e+00> : vector<16x32xf32>
    %15 = tpu.matmul %1, %7, %cst {dimension_numbers = #tpu.dot_dimension_numbers<[1], [0], [0], [1], [0, 0, 1, 1], [], []>} : vector<16x32xbf16>, vector<32x32xbf16>, vector<16x32xf32> -> vector<16x32xf32>
    %c0_15 = arith.constant 0 : index
    %c0_16 = arith.constant 0 : index
    %16 = vector.load %arg5[%c0_15, %c0_16] : memref<1x32xf32, #tpu.memory_space<vmem>>, vector<1x32xf32>
    %17 = vector.broadcast %16 : vector<1x32xf32> to vector<16x32xf32>
    %18 = arith.addf %15, %17 : vector<16x32xf32>
    %cst_17 = arith.constant 0.353553385 : f32
    %19 = vector.broadcast %cst_17 : f32 to vector<16x32xf32>
    %20 = arith.mulf %18, %19 : vector<16x32xf32>
    %cst_18 = arith.constant dense<0.000000e+00> : vector<16x32xf32>
    %21 = tpu.matmul %3, %9, %cst_18 {dimension_numbers = #tpu.dot_dimension_numbers<[1], [0], [0], [1], [0, 0, 1, 1], [], []>} : vector<16x32xbf16>, vector<32x32xbf16>, vector<16x32xf32> -> vector<16x32xf32>
    %c0_19 = arith.constant 0 : index
    %c0_20 = arith.constant 0 : index
    %22 = vector.load %arg7[%c0_19, %c0_20] : memref<1x32xf32, #tpu.memory_space<vmem>>, vector<1x32xf32>
    %23 = vector.broadcast %22 : vector<1x32xf32> to vector<16x32xf32>
    %24 = arith.addf %21, %23 : vector<16x32xf32>
    %cst_21 = arith.constant dense<0.000000e+00> : vector<16x32xf32>
    %25 = tpu.matmul %5, %11, %cst_21 {dimension_numbers = #tpu.dot_dimension_numbers<[1], [0], [0], [1], [0, 0, 1, 1], [], []>} : vector<16x32xbf16>, vector<32x32xbf16>, vector<16x32xf32> -> vector<16x32xf32>
    %c0_22 = arith.constant 0 : index
    %c0_23 = arith.constant 0 : index
    %26 = vector.load %arg9[%c0_22, %c0_23] : memref<1x32xf32, #tpu.memory_space<vmem>>, vector<1x32xf32>
    %27 = vector.broadcast %26 : vector<1x32xf32> to vector<16x32xf32>
    %28 = arith.addf %25, %27 : vector<16x32xf32>
    %29 = arith.truncf %20 : vector<16x32xf32> to vector<16x32xbf16>
    %30 = arith.truncf %24 : vector<16x32xf32> to vector<16x32xbf16>
    %31 = arith.truncf %28 : vector<16x32xf32> to vector<16x32xbf16>
    %cst_24 = arith.constant 0.000000e+00 : f32
    %32 = vector.broadcast %cst_24 : f32 to vector<16x32xf32>
    %33 = vector.extract_strided_slice %29 {offsets = [0, 0], sizes = [16, 8], strides = [1, 1]} : vector<16x32xbf16> to vector<16x8xbf16>
    %34 = vector.extract_strided_slice %30 {offsets = [0, 0], sizes = [16, 8], strides = [1, 1]} : vector<16x32xbf16> to vector<16x8xbf16>
    %35 = vector.extract_strided_slice %31 {offsets = [0, 0], sizes = [16, 8], strides = [1, 1]} : vector<16x32xbf16> to vector<16x8xbf16>
    %36 = vector.extract_strided_slice %13 {offsets = [0, 0], sizes = [8, 32], strides = [1, 1]} : vector<32x32xbf16> to vector<8x32xbf16>
    %cst_25 = arith.constant dense<0.000000e+00> : vector<16x16xf32>
    %37 = tpu.matmul %33, %34, %cst_25 {dimension_numbers = #tpu.dot_dimension_numbers<[1], [1], [0], [0], [0, 0, 1, 0], [], []>} : vector<16x8xbf16>, vector<16x8xbf16>, vector<16x16xf32> -> vector<16x16xf32>
    %38 = arith.addf %37, %14 : vector<16x16xf32>
    %cst_26 = arith.constant dense<0xFF800000> : vector<16xf32>
    %39 = vector.multi_reduction <maximumf>, %38, %cst_26 [1] : vector<16x16xf32> to vector<16xf32>
    %40 = vector.shape_cast %39 : vector<16xf32> to vector<16x1xf32>
    %41 = vector.broadcast %40 : vector<16x1xf32> to vector<16x16xf32>
    %42 = arith.subf %38, %41 : vector<16x16xf32>
    %43 = math.exp %42 : vector<16x16xf32>
    %cst_27 = arith.constant dense<0.000000e+00> : vector<16xf32>
    %44 = vector.multi_reduction <add>, %43, %cst_27 [1] : vector<16x16xf32> to vector<16xf32>
    %45 = vector.shape_cast %44 : vector<16xf32> to vector<16x1xf32>
    %46 = tpu.reciprocal %45 {approx = true} : vector<16x1xf32> -> vector<16x1xf32>
    %47 = vector.broadcast %46 : vector<16x1xf32> to vector<16x16xf32>
    %48 = arith.mulf %43, %47 : vector<16x16xf32>
    %49 = arith.truncf %48 : vector<16x16xf32> to vector<16x16xbf16>
    %cst_28 = arith.constant dense<0.000000e+00> : vector<16x8xf32>
    %50 = tpu.matmul %49, %35, %cst_28 {dimension_numbers = #tpu.dot_dimension_numbers<[1], [0], [0], [1], [0, 0, 1, 1], [], []>} : vector<16x16xbf16>, vector<16x8xbf16>, vector<16x8xf32> -> vector<16x8xf32>
    %51 = arith.truncf %50 : vector<16x8xf32> to vector<16x8xbf16>
    %cst_29 = arith.constant dense<0.000000e+00> : vector<16x32xf32>
    %52 = tpu.matmul %51, %36, %cst_29 {dimension_numbers = #tpu.dot_dimension_numbers<[1], [0], [0], [1], [0, 0, 1, 1], [], []>} : vector<16x8xbf16>, vector<8x32xbf16>, vector<16x32xf32> -> vector<16x32xf32>
    %53 = arith.addf %32, %52 : vector<16x32xf32>
    %54 = vector.extract_strided_slice %29 {offsets = [0, 8], sizes = [16, 8], strides = [1, 1]} : vector<16x32xbf16> to vector<16x8xbf16>
    %55 = vector.extract_strided_slice %30 {offsets = [0, 8], sizes = [16, 8], strides = [1, 1]} : vector<16x32xbf16> to vector<16x8xbf16>
    %56 = vector.extract_strided_slice %31 {offsets = [0, 8], sizes = [16, 8], strides = [1, 1]} : vector<16x32xbf16> to vector<16x8xbf16>
    %57 = vector.extract_strided_slice %13 {offsets = [8, 0], sizes = [8, 32], strides = [1, 1]} : vector<32x32xbf16> to vector<8x32xbf16>
    %cst_30 = arith.constant dense<0.000000e+00> : vector<16x16xf32>
    %58 = tpu.matmul %54, %55, %cst_30 {dimension_numbers = #tpu.dot_dimension_numbers<[1], [1], [0], [0], [0, 0, 1, 0], [], []>} : vector<16x8xbf16>, vector<16x8xbf16>, vector<16x16xf32> -> vector<16x16xf32>
    %59 = arith.addf %58, %14 : vector<16x16xf32>
    %cst_31 = arith.constant dense<0xFF800000> : vector<16xf32>
    %60 = vector.multi_reduction <maximumf>, %59, %cst_31 [1] : vector<16x16xf32> to vector<16xf32>
    %61 = vector.shape_cast %60 : vector<16xf32> to vector<16x1xf32>
    %62 = vector.broadcast %61 : vector<16x1xf32> to vector<16x16xf32>
    %63 = arith.subf %59, %62 : vector<16x16xf32>
    %64 = math.exp %63 : vector<16x16xf32>
    %cst_32 = arith.constant dense<0.000000e+00> : vector<16xf32>
    %65 = vector.multi_reduction <add>, %64, %cst_32 [1] : vector<16x16xf32> to vector<16xf32>
    %66 = vector.shape_cast %65 : vector<16xf32> to vector<16x1xf32>
    %67 = tpu.reciprocal %66 {approx = true} : vector<16x1xf32> -> vector<16x1xf32>
    %68 = vector.broadcast %67 : vector<16x1xf32> to vector<16x16xf32>
    %69 = arith.mulf %64, %68 : vector<16x16xf32>
    %70 = arith.truncf %69 : vector<16x16xf32> to vector<16x16xbf16>
    %cst_33 = arith.constant dense<0.000000e+00> : vector<16x8xf32>
    %71 = tpu.matmul %70, %56, %cst_33 {dimension_numbers = #tpu.dot_dimension_numbers<[1], [0], [0], [1], [0, 0, 1, 1], [], []>} : vector<16x16xbf16>, vector<16x8xbf16>, vector<16x8xf32> -> vector<16x8xf32>
    %72 = arith.truncf %71 : vector<16x8xf32> to vector<16x8xbf16>
    %cst_34 = arith.constant dense<0.000000e+00> : vector<16x32xf32>
    %73 = tpu.matmul %72, %57, %cst_34 {dimension_numbers = #tpu.dot_dimension_numbers<[1], [0], [0], [1], [0, 0, 1, 1], [], []>} : vector<16x8xbf16>, vector<8x32xbf16>, vector<16x32xf32> -> vector<16x32xf32>
    %74 = arith.addf %53, %73 : vector<16x32xf32>
    %75 = vector.extract_strided_slice %29 {offsets = [0, 16], sizes = [16, 8], strides = [1, 1]} : vector<16x32xbf16> to vector<16x8xbf16>
    %76 = vector.extract_strided_slice %30 {offsets = [0, 16], sizes = [16, 8], strides = [1, 1]} : vector<16x32xbf16> to vector<16x8xbf16>
    %77 = vector.extract_strided_slice %31 {offsets = [0, 16], sizes = [16, 8], strides = [1, 1]} : vector<16x32xbf16> to vector<16x8xbf16>
    %78 = vector.extract_strided_slice %13 {offsets = [16, 0], sizes = [8, 32], strides = [1, 1]} : vector<32x32xbf16> to vector<8x32xbf16>
    %cst_35 = arith.constant dense<0.000000e+00> : vector<16x16xf32>
    %79 = tpu.matmul %75, %76, %cst_35 {dimension_numbers = #tpu.dot_dimension_numbers<[1], [1], [0], [0], [0, 0, 1, 0], [], []>} : vector<16x8xbf16>, vector<16x8xbf16>, vector<16x16xf32> -> vector<16x16xf32>
    %80 = arith.addf %79, %14 : vector<16x16xf32>
    %cst_36 = arith.constant dense<0xFF800000> : vector<16xf32>
    %81 = vector.multi_reduction <maximumf>, %80, %cst_36 [1] : vector<16x16xf32> to vector<16xf32>
    %82 = vector.shape_cast %81 : vector<16xf32> to vector<16x1xf32>
    %83 = vector.broadcast %82 : vector<16x1xf32> to vector<16x16xf32>
    %84 = arith.subf %80, %83 : vector<16x16xf32>
    %85 = math.exp %84 : vector<16x16xf32>
    %cst_37 = arith.constant dense<0.000000e+00> : vector<16xf32>
    %86 = vector.multi_reduction <add>, %85, %cst_37 [1] : vector<16x16xf32> to vector<16xf32>
    %87 = vector.shape_cast %86 : vector<16xf32> to vector<16x1xf32>
    %88 = tpu.reciprocal %87 {approx = true} : vector<16x1xf32> -> vector<16x1xf32>
    %89 = vector.broadcast %88 : vector<16x1xf32> to vector<16x16xf32>
    %90 = arith.mulf %85, %89 : vector<16x16xf32>
    %91 = arith.truncf %90 : vector<16x16xf32> to vector<16x16xbf16>
    %cst_38 = arith.constant dense<0.000000e+00> : vector<16x8xf32>
    %92 = tpu.matmul %91, %77, %cst_38 {dimension_numbers = #tpu.dot_dimension_numbers<[1], [0], [0], [1], [0, 0, 1, 1], [], []>} : vector<16x16xbf16>, vector<16x8xbf16>, vector<16x8xf32> -> vector<16x8xf32>
    %93 = arith.truncf %92 : vector<16x8xf32> to vector<16x8xbf16>
    %cst_39 = arith.constant dense<0.000000e+00> : vector<16x32xf32>
    %94 = tpu.matmul %93, %78, %cst_39 {dimension_numbers = #tpu.dot_dimension_numbers<[1], [0], [0], [1], [0, 0, 1, 1], [], []>} : vector<16x8xbf16>, vector<8x32xbf16>, vector<16x32xf32> -> vector<16x32xf32>
    %95 = arith.addf %74, %94 : vector<16x32xf32>
    %96 = vector.extract_strided_slice %29 {offsets = [0, 24], sizes = [16, 8], strides = [1, 1]} : vector<16x32xbf16> to vector<16x8xbf16>
    %97 = vector.extract_strided_slice %30 {offsets = [0, 24], sizes = [16, 8], strides = [1, 1]} : vector<16x32xbf16> to vector<16x8xbf16>
    %98 = vector.extract_strided_slice %31 {offsets = [0, 24], sizes = [16, 8], strides = [1, 1]} : vector<16x32xbf16> to vector<16x8xbf16>
    %99 = vector.extract_strided_slice %13 {offsets = [24, 0], sizes = [8, 32], strides = [1, 1]} : vector<32x32xbf16> to vector<8x32xbf16>
    %cst_40 = arith.constant dense<0.000000e+00> : vector<16x16xf32>
    %100 = tpu.matmul %96, %97, %cst_40 {dimension_numbers = #tpu.dot_dimension_numbers<[1], [1], [0], [0], [0, 0, 1, 0], [], []>} : vector<16x8xbf16>, vector<16x8xbf16>, vector<16x16xf32> -> vector<16x16xf32>
    %101 = arith.addf %100, %14 : vector<16x16xf32>
    %cst_41 = arith.constant dense<0xFF800000> : vector<16xf32>
    %102 = vector.multi_reduction <maximumf>, %101, %cst_41 [1] : vector<16x16xf32> to vector<16xf32>
    %103 = vector.shape_cast %102 : vector<16xf32> to vector<16x1xf32>
    %104 = vector.broadcast %103 : vector<16x1xf32> to vector<16x16xf32>
    %105 = arith.subf %101, %104 : vector<16x16xf32>
    %106 = math.exp %105 : vector<16x16xf32>
    %cst_42 = arith.constant dense<0.000000e+00> : vector<16xf32>
    %107 = vector.multi_reduction <add>, %106, %cst_42 [1] : vector<16x16xf32> to vector<16xf32>
    %108 = vector.shape_cast %107 : vector<16xf32> to vector<16x1xf32>
    %109 = tpu.reciprocal %108 {approx = true} : vector<16x1xf32> -> vector<16x1xf32>
    %110 = vector.broadcast %109 : vector<16x1xf32> to vector<16x16xf32>
    %111 = arith.mulf %106, %110 : vector<16x16xf32>
    %112 = arith.truncf %111 : vector<16x16xf32> to vector<16x16xbf16>
    %cst_43 = arith.constant dense<0.000000e+00> : vector<16x8xf32>
    %113 = tpu.matmul %112, %98, %cst_43 {dimension_numbers = #tpu.dot_dimension_numbers<[1], [0], [0], [1], [0, 0, 1, 1], [], []>} : vector<16x16xbf16>, vector<16x8xbf16>, vector<16x8xf32> -> vector<16x8xf32>
    %114 = arith.truncf %113 : vector<16x8xf32> to vector<16x8xbf16>
    %cst_44 = arith.constant dense<0.000000e+00> : vector<16x32xf32>
    %115 = tpu.matmul %114, %99, %cst_44 {dimension_numbers = #tpu.dot_dimension_numbers<[1], [0], [0], [1], [0, 0, 1, 1], [], []>} : vector<16x8xbf16>, vector<8x32xbf16>, vector<16x32xf32> -> vector<16x32xf32>
    %116 = arith.addf %95, %115 : vector<16x32xf32>
    %c0_45 = arith.constant 0 : index
    %c0_46 = arith.constant 0 : index
    %117 = vector.load %arg11[%c0_45, %c0_46] : memref<1x32xf32, #tpu.memory_space<vmem>>, vector<1x32xf32>
    %118 = vector.broadcast %117 : vector<1x32xf32> to vector<16x32xf32>
    %119 = arith.addf %116, %118 : vector<16x32xf32>
    %c0_47 = arith.constant 0 : index
    %c0_48 = arith.constant 0 : index
    %120 = vector.load %arg12[%c0_47, %c0_48] : memref<16x32xf32, #tpu.memory_space<vmem>>, vector<16x32xf32>
    tpu.vector_store %arg12[%c0_47, %c0_48], %119 {strides = array<i32>} : memref<16x32xf32, #tpu.memory_space<vmem>>, vector<16x32xf32>,
    return
  }
}

</mosaic_0001>

<bundles_post_ra>
// kernel: tpu_custom_call.1
= control target key start
LH: loop header
LB: loop body
LE: loop exit
PB: predicated region body
PF: predicated region fallthrough
CT: control target
= control target key end

     0   :  { %17 = vsyncpa [#allocation3], 0  ;;  %s1806_s0 = inlined_call_operand.hbm [shape: f32[16,32], index: 0, kind: input, shape index: {}]   ;;  %s1807_s1 = inlined_call_operand.hbm [shape: f32[16,32], index: 1, kind: input, shape index: {}]   ;;  %s1808_s2 = inlined_call_operand.hbm [shape: f32[16,32], index: 2, kind: input, shape index: {}]   ;;  %s1809_s3 = inlined_call_operand.hbm [shape: f32[16,16], index: 3, kind: input, shape index: {}]   ;;  %s1810_s4 = inlined_call_operand.hbm [shape: f32[32,32], index: 4, kind: input, shape index: {}]   ;;  %s1811_s5 = inlined_call_operand.vmem [shape: f32[1,32], index: 5, kind: input, shape index: {}]   ;;  %s1812_s6 = inlined_call_operand.hbm [shape: f32[32,32], index: 6, kind: input, shape index: {}]   ;;  %s1813_s7 = inlined_call_operand.vmem [shape: f32[1,32], index: 7, kind: input, shape index: {}]   ;;  %s1814_s8 = inlined_call_operand.hbm [shape: f32[32,32], index: 8, kind: input, shape index: {}]   ;;  %s1815_s9 = inlined_call_operand.vmem [shape: f32[1,32], index: 9, kind: input, shape index: {}]   ;;  %s1816_s10 = inlined_call_operand.vmem [shape: f32[32,32], index: 10, kind: input, shape index: {}]   ;;  %s1817_s11 = inlined_call_operand.vmem [shape: f32[1,32], index: 11, kind: input, shape index: {}]   ;;  %s1818_s12 = inlined_call_operand.hbm [shape: f32[16,32], index: 12, kind: output, shape index: {}]  }
   0x1   :  { %18 = vsyncpa [#allocation6], 0 }
   0x2   :  { %19 = vsyncpa [#allocation9], 0 }
   0x3   :  { %20 = vsyncpa [#allocation12], 0 }
   0x4   :  { %21 = vsyncpa [#allocation4], 0  ;;  %s1427_s21 = smov [#allocation5]   ;;  %s1428_s23 = smov [#allocation8]  }
   0x5   :  { %s39_s22 = sshll.u32 %s1427_s21, 4  ;;  %s63_s24 = sshll.u32 %s1428_s23, 4  ;;  %s40_s22 = int_to_ptr.vmem [resolvable:$true] %s39_s22  ;;  %s1507_s24 = int_to_ptr.vmem [resolvable:$true] %s63_s24 }
   0x6   :  { %s1241_s27 = scalar_lea.hbm %s1807_s1, 256 }
   0x7   :  { %p1242_p0 = scmp.ne.s32.totalorder %s1807_s1, %s1241_s27  ;;  %p1245_p1 = scmp.lt.u32.totalorder %s1241_s27, %s1807_s1 }
   0x9   :  { %p1247_p2 = pnand %p1245_p1, %p1242_p0 }
   0xb   :  { %1250 = shalt.err (!%p1247_p2)
}
   0xc   :  { %s1251_s14 = scalar_lea.vmem %s40_s22, 256  ;;  %p1256_p4 = scmp.lt.s32.totalorder %s40_s22, %s40_s22 }
   0xd   :  { %p1252_p3 = scmp.ne.s32.totalorder %s40_s22, %s1251_s14  ;;  %p1257_p5 = scmp.lt.s32.totalorder %s1251_s14, %s1251_s14 }
   0xf   :  { %p1258_p6 = por %p1257_p5, %p1256_p4 }
  0x11   :  { %p1259_p7 = pnand %p1258_p6, %p1252_p3 }
  0x13   :  { %1262 = shalt.err (!%p1259_p7)
}
  0x14   :  { %s1429_s15 = smov 128   ;;  %s1430_s16 = smov 8  }
  0x15   :  { %45 = dma.hbm_to_vmem [thread:$0]  %s1807_s1, 256, %s40_s22, [#allocation6], %s1429_s15, %s1429_s15, %s1430_s16  }
  0x16   :  { %s1263_s21 = scalar_lea.hbm %s1809_s3, 256 }
  0x17   :  { %p1264_p8 = scmp.ne.s32.totalorder %s1809_s3, %s1263_s21  ;;  %p1267_p9 = scmp.lt.u32.totalorder %s1263_s21, %s1809_s3 }
  0x19   :  { %p1269_p10 = pnand %p1267_p9, %p1264_p8 }
  0x1b   :  { %1272 = shalt.err (!%p1269_p10)
}
  0x1c   :  { %s1273_s28 = scalar_lea.vmem %s1507_s24, 256  ;;  %p1278_p12 = scmp.lt.s32.totalorder %s1507_s24, %s1507_s24 }
  0x1d   :  { %p1274_p11 = scmp.ne.s32.totalorder %s1507_s24, %s1273_s28  ;;  %p1279_p13 = scmp.lt.s32.totalorder %s1273_s28, %s1273_s28 }
  0x1f   :  { %p1280_p0 = por %p1279_p13, %p1278_p12 }
  0x21   :  { %p1281_p1 = pnand %p1280_p0, %p1274_p11 }
  0x23   :  { %1284 = shalt.err (!%p1281_p1)
}
  0x24   :  { %69 = dma.hbm_to_vmem [thread:$0]  %s1809_s3, 256, %s1507_s24, [#allocation9], %s1429_s15, %s1429_s15, %s1430_s16  }
  0x25   :  { %s1431_s29 = smov [#allocation11]   ;;  %s1432_s13 = smov [#allocation2]  }
  0x26   :  { %s89_s30 = sshll.u32 %s1431_s29, 4  ;;  %s27_s14 = sshll.u32 %s1432_s13, 4  ;;  %s90_s30 = int_to_ptr.vmem [resolvable:$true] %s89_s30  ;;  %s1544_s14 = int_to_ptr.vmem [resolvable:$true] %s27_s14 }
  0x27   :  { %s1285_s19 = scalar_lea.hbm %s1812_s6, 512 }
  0x28   :  { %p1286_p2 = scmp.ne.s32.totalorder %s1812_s6, %s1285_s19  ;;  %p1289_p3 = scmp.lt.u32.totalorder %s1285_s19, %s1812_s6 }
  0x2a   :  { %p1291_p4 = pnand %p1289_p3, %p1286_p2 }
  0x2c   :  { %1294 = shalt.err (!%p1291_p4)
}
  0x2d   :  { %s1295_s3 = scalar_lea.vmem %s90_s30, 512  ;;  %p1300_p6 = scmp.lt.s32.totalorder %s90_s30, %s90_s30 }
  0x2e   :  { %p1296_p5 = scmp.ne.s32.totalorder %s90_s30, %s1295_s3  ;;  %p1301_p7 = scmp.lt.s32.totalorder %s1295_s3, %s1295_s3 }
  0x30   :  { %p1302_p8 = por %p1301_p7, %p1300_p6 }
  0x32   :  { %p1303_p9 = pnand %p1302_p8, %p1296_p5 }
  0x34   :  { %1306 = shalt.err (!%p1303_p9)
}
  0x35   :  { %95 = dma.hbm_to_vmem [thread:$0]  %s1812_s6, 512, %s90_s30, [#allocation12], %s1429_s15, %s1429_s15, %s1430_s16  }
  0x36   :  { %s1307_s1 = scalar_lea.hbm %s1806_s0, 256 }
  0x37   :  { %p1308_p10 = scmp.ne.s32.totalorder %s1806_s0, %s1307_s1  ;;  %p1311_p11 = scmp.lt.u32.totalorder %s1307_s1, %s1806_s0 }
  0x39   :  { %p1313_p12 = pnand %p1311_p11, %p1308_p10 }
  0x3b   :  { %1316 = shalt.err (!%p1313_p12)
}
  0x3c   :  { %s1317_s18 = scalar_lea.vmem %s1544_s14, 256  ;;  %p1322_p0 = scmp.lt.s32.totalorder %s1544_s14, %s1544_s14 }
  0x3d   :  { %p1318_p13 = scmp.ne.s32.totalorder %s1544_s14, %s1317_s18  ;;  %p1323_p1 = scmp.lt.s32.totalorder %s1317_s18, %s1317_s18 }
  0x3f   :  { %p1324_p2 = por %p1323_p1, %p1322_p0 }
  0x41   :  { %p1325_p3 = pnand %p1324_p2, %p1318_p13 }
  0x43   :  { %1328 = shalt.err (!%p1325_p3)
}
  0x44   :  { %33 = dma.hbm_to_vmem [thread:$0]  %s1806_s0, 256, %s1544_s14, [#allocation3], %s1429_s15, %s1429_s15, %s1430_s16  }
  0x45   :  { %s1433_s19 = smov [#allocation7]   ;;  %s1434_s21 = smov [#allocation10]  }
  0x46   :  { %s51_s20 = sshll.u32 %s1433_s19, 4  ;;  %s75_s23 = sshll.u32 %s1434_s21, 4  ;;  %s52_s20 = int_to_ptr.vmem [resolvable:$true] %s51_s20  ;;  %s1581_s23 = int_to_ptr.vmem [resolvable:$true] %s75_s23 }
  0x47   :  { %s1329_s24 = scalar_lea.hbm %s1808_s2, 256 }
  0x48   :  { %p1330_p4 = scmp.ne.s32.totalorder %s1808_s2, %s1329_s24  ;;  %p1333_p5 = scmp.lt.u32.totalorder %s1329_s24, %s1808_s2 }
  0x4a   :  { %p1335_p6 = pnand %p1333_p5, %p1330_p4 }
  0x4c   :  { %1338 = shalt.err (!%p1335_p6)
}
  0x4d   :  { %s1339_s0 = scalar_lea.vmem %s52_s20, 256  ;;  %p1344_p8 = scmp.lt.s32.totalorder %s52_s20, %s52_s20 }
  0x4e   :  { %p1340_p7 = scmp.ne.s32.totalorder %s52_s20, %s1339_s0  ;;  %p1345_p9 = scmp.lt.s32.totalorder %s1339_s0, %s1339_s0 }
  0x50   :  { %p1346_p10 = por %p1345_p9, %p1344_p8 }
  0x52   :  { %p1347_p11 = pnand %p1346_p10, %p1340_p7 }
  0x54   :  { %1350 = shalt.err (!%p1347_p11)
}
  0x55   :  { %57 = dma.hbm_to_vmem [thread:$0]  %s1808_s2, 256, %s52_s20, [#allocation6], %s1429_s15, %s1429_s15, %s1430_s16  }
  0x56   :  { %s1351_s17 = scalar_lea.hbm %s1810_s4, 512 }
  0x57   :  { %p1352_p12 = scmp.ne.s32.totalorder %s1810_s4, %s1351_s17  ;;  %p1355_p13 = scmp.lt.u32.totalorder %s1351_s17, %s1810_s4 }
  0x59   :  { %p1357_p0 = pnand %p1355_p13, %p1352_p12 }
  0x5b   :  { %1360 = shalt.err (!%p1357_p0)
}
  0x5c   :  { %s1361_s21 = scalar_lea.vmem %s1581_s23, 512  ;;  %p1366_p2 = scmp.lt.s32.totalorder %s1581_s23, %s1581_s23 }
  0x5d   :  { %p1362_p1 = scmp.ne.s32.totalorder %s1581_s23, %s1361_s21  ;;  %p1367_p3 = scmp.lt.s32.totalorder %s1361_s21, %s1361_s21 }
  0x5f   :  { %p1368_p4 = por %p1367_p3, %p1366_p2 }
  0x61   :  { %p1369_p5 = pnand %p1368_p4, %p1362_p1 }
  0x63   :  { %1372 = shalt.err (!%p1369_p5)
}
  0x64   :  { %81 = dma.hbm_to_vmem [thread:$0]  %s1810_s4, 512, %s1581_s23, [#allocation9], %s1429_s15, %s1429_s15, %s1430_s16  }
  0x65   :  { %s1435_s25 = smov [#allocation13]   ;;  %s1373_s27 = scalar_lea.hbm %s1814_s8, 512 }
  0x66   :  { %s103_s3 = sshll.u32 %s1435_s25, 4  ;;  %p1374_p6 = scmp.ne.s32.totalorder %s1814_s8, %s1373_s27  ;;  %s104_s3 = int_to_ptr.vmem [resolvable:$true] %s103_s3 }
  0x67   :  { %p1377_p7 = scmp.lt.u32.totalorder %s1373_s27, %s1814_s8 }
  0x69   :  { %p1379_p8 = pnand %p1377_p7, %p1374_p6 }
  0x6b   :  { %1382 = shalt.err (!%p1379_p8)
}
  0x6c   :  { %s1383_s22 = scalar_lea.vmem %s104_s3, 512  ;;  %p1388_p10 = scmp.lt.s32.totalorder %s104_s3, %s104_s3 }
  0x6d   :  { %p1384_p9 = scmp.ne.s32.totalorder %s104_s3, %s1383_s22  ;;  %p1389_p11 = scmp.lt.s32.totalorder %s1383_s22, %s1383_s22 }
  0x6f   :  { %p1390_p12 = por %p1389_p11, %p1388_p10 }
  0x71   :  { %p1391_p13 = pnand %p1390_p12, %p1384_p9 }
  0x73   :  { %1394 = shalt.err (!%p1391_p13)
}
  0x74   :  { %109 = dma.hbm_to_vmem [thread:$0]  %s1814_s8, 512, %s104_s3, [#allocation12], %s1429_s15, %s1429_s15, %s1430_s16  }
  0x75   :  { %1417 = dma.done.wait [#allocation3], 256  }
  0x76   :  { %1418 = vsyncadd [#allocation3], 4294967040 }
  0x77   :  { %1419 = dma.done.wait [#allocation6], 512  }
  0x78   :  { %1420 = vsyncadd [#allocation6], 4294966784 }
  0x79   :  { %1421 = dma.done.wait [#allocation9], 768  }
  0x7a   :  { %1422 = vsyncadd [#allocation9], 4294966528 }
  0x7b   :  { %1423 = dma.done.wait [#allocation12], 1024  }
  0x7c   :  { %1424 = vsyncadd [#allocation12], 4294966272  ;;  %v1436_v0 = vmov 0.0   ;;  %vm1437_vm0 = vmmov 0   ;;  %v153_v1 = vld [vmem:[#allocation11] sm:$0xff]  ;;  %v154_v2 = vld [vmem:[#allocation11 + $0x8] sm:$0xff] }
  0x7d   :  { %1106 = vmatprep.subr.bf16.mxu1 %v1436_v0  ;;  %1098 = vmatprep.subr.bf16.mxu0 %v1436_v0  ;;  %v147_v3 = vld [vmem:[#allocation10] sm:$0xff]  ;;  %v157_v4 = vpack.c.bf16 %v154_v2, %v153_v1  ;;  %v148_v5 = vld [vmem:[#allocation10 + $0x8] sm:$0xff]  ;;  %v155_v6 = vld [vmem:[#allocation11 + $0x10] sm:$0xff]  ;;  %vm180_vm1 = vcmask 261120   ;;  %vm332_vm2 = vcmask 64512   ;;  %vm380_vm3 = vcmask 130048  }
  0x7e   :  { %1110 = vmatprep.mubr.msk.bf16.mxu1 %vm1437_vm0, %v1436_v0  ;;  %1102 = vmatprep.mubr.msk.bf16.mxu0 %vm1437_vm0, %v1436_v0  ;;  %v156_v7 = vld [vmem:[#allocation11 + $0x18] sm:$0xff]  ;;  %v151_v8 = vpack.c.bf16 %v148_v5, %v147_v3  ;;  %v149_v9 = vld [vmem:[#allocation10 + $0x10] sm:$0xff]  ;;  %v138_v15 = vld [vmem:[#allocation2] sm:$0xff]  ;;  %vm579_vm4 = vcmask 1043456   ;;  %s1440_s2 = smov 104   ;;  %s1441_s27 = smov [#allocation14]  }
  0x7f   :  { %1107 = vmatpush3.bf16.msra.mxu1 %v157_v4  ;;  %v158_v10 = vpack.c.bf16 %v156_v7, %v155_v6  ;;  %v141_v11 = vld [vmem:[#allocation5] sm:$0xff]  ;;  %v142_v12 = vld [vmem:[#allocation5 + $0x8] sm:$0xff]  ;;  %v139_v16 = vld [vmem:[#allocation2 + $0x8] sm:$0xff]  ;;  %s1031_s28 = sshll.u32 %s1441_s27, 4  ;;  %s1032_s28 = int_to_ptr.vmem [resolvable:$true] %s1031_s28 }
  0x80   :  { %v150_v13 = vld [vmem:[#allocation10 + $0x18] sm:$0xff]  ;;  %1108 = vmatprep.subr.bf16.mxu1 %v1436_v0  ;;  %1099 = vmatpush3.bf16.msra.mxu0 %v151_v8  ;;  %v143_v17 = vpack.c.bf16 %v142_v12, %v141_v11  ;;  %v140_v18 = vpack.c.bf16 %v139_v16, %v138_v15  ;;  %v1046_v19 = vld [vmem:[%s1811_s5] ss:$0 sm:$0xff]  ;;  %s1438_s5 = smov 120   ;;  %v160_v39 = vld [vmem:[#allocation13 + $0x8] sm:$0xff]  ;;  %s1395_s1 = scalar_lea.vmem %s1032_s28, 256 }
  0x81   :  { %v152_v14 = vpack.c.bf16 %v150_v13, %v149_v9  ;;  %1100 = vmatprep.subr.bf16.mxu0 %v1436_v0  ;;  %v1048_v20 = vld [vmem:[%s1813_s7] ss:$0 sm:$0xff]  ;;  %v161_v40 = vld [vmem:[#allocation13 + $0x10] sm:$0xff]  ;;  %v162_v42 = vld [vmem:[#allocation13 + $0x18] sm:$0xff]  ;;  %s1439_s7 = smov 112   ;;  %p1396_p0 = scmp.ne.s32.totalorder %s1032_s28, %s1395_s1 }
  0x82   :  { %v159_v38 = vld [vmem:[#allocation13] sm:$0xff]  ;;  %v164_v43 = vpack.c.bf16 %v162_v42, %v161_v40  ;;  %v145_v45 = vld [vmem:[#allocation7 + $0x8] sm:$0xff]  ;;  %v1680_v50 = vld [vmem:[#allocation8] sm:$0xff]  ;;  %p1400_p1 = scmp.lt.s32.totalorder %s1032_s28, %s1032_s28  ;;  %p1401_p2 = scmp.lt.s32.totalorder %s1395_s1, %s1395_s1 }
  0x83   :  { %1109 = vmatpush3.bf16.msra.mxu1 %v158_v10  ;;  %v163_v41 = vpack.c.bf16 %v160_v39, %v159_v38  ;;  %v144_v44 = vld [vmem:[#allocation7] sm:$0xff]  ;;  %v1682_v52 = vld [vmem:[#allocation8 + $0x8] sm:$0xff] }
  0x84   :  { %1101 = vmatpush3.bf16.msra.mxu0 %v152_v14  ;;  %1122 = vmatprep.subr.bf16.mxu1 %v1436_v0  ;;  %v146_v46 = vpack.c.bf16 %v145_v45, %v144_v44  ;;  %v1050_v11 = vld [vmem:[%s1815_s9] ss:$0 sm:$0xff]  ;;  %p1402_p3 = por %p1401_p2, %p1400_p1 }
  0x85   :  { %1114 = vmatprep.subr.bf16.mxu0 %v1436_v0  ;;  %v165_v42 = vld [vmem:[%s1816_s10] sm:$0xff] }
  0x86   :  { %1111 = vmatmul.mubr.msk.bf16.vlgmr.msra.gmra.mrb[0].mxu1 %vm180_vm1, %v143_v17  ;;  %p1403_p4 = pnand %p1402_p3, %p1396_p0 }
  0x87   :  { %1103 = vmatmul.mubr.msk.bf16.vlgmr.msra.gmra.mrb[0].mxu0 %vm180_vm1, %v140_v18  ;;  %1124 = vmatprep.mubr.msk.bf16.mxu1 %vm1437_vm0, %v1436_v0 }
  0x88   :  { %1118 = vmatprep.mubr.msk.bf16.mxu0 %vm1437_vm0, %v1436_v0  ;;  %1115 = vmatpush3.bf16.msra.mxu0 %v163_v41 }
  0x89   :  { %1116 = vmatprep.subr.bf16.mxu0 %v1436_v0 }
  0x8c   :  { %1117 = vmatpush3.bf16.msra.mxu0 %v164_v43  ;;  %v166_v43 = vld [vmem:[%s1816_s10 + $0x8] sm:$0xff] }
  0x8d   :  { %1128 = vmatprep.subr.bf16.mxu0 %v1436_v0  ;;  %v169_v44 = vpack.c.bf16 %v166_v43, %v165_v42 }
  0x8f   :  { %1119 = vmatmul.mubr.msk.bf16.vlgmr.msra.gmra.mrb[4].mxu0 %vm180_vm1, %v146_v46  ;;  %v575_v45 = vrot.slane %v169_v44, 4 }
  0x90   :  { %1130 = vmatprep.mubr.msk.bf16.mxu0 %vm1437_vm0, %v1436_v0 }
  0x91   :  { %v581_v46 = vsel %vm579_vm4, %v575_v45, 0 }
 0x159   :  { %v271_v21 = vpop.f32.mrb[0].mxu1 }
 0x15a   :  { %v1112_v22 = vpop.f32.mrb[1].mxu1  ;;  %v218_v23 = vpop.f32.mrb[0].mxu0  ;;  %v272_v27 = vadd.f32 %v1048_v20, %v271_v21 }
 0x15b   :  { %v274_v24 = vpop.f32.mrb[2].mxu1  ;;  %v219_v25 = vadd.f32 %v1046_v19, %v218_v23  ;;  %v1104_v26 = vpop.f32.mrb[1].mxu0 }
 0x15c   :  { %v275_v28 = vadd.f32 %v1048_v20, %v274_v24  ;;  %v1113_v29 = vpop.f32.mrb[3].mxu1  ;;  %v221_v30 = vpop.f32.mrb[2].mxu0 }
 0x15d   :  { %v225_v31 = vmul.f32 0.35355338, %v219_v25  ;;  %v222_v32 = vadd.f32 %v1046_v19, %v221_v30  ;;  %v1105_v33 = vpop.f32.mrb[3].mxu0 }
 0x15e   :  { %v1655_v34 = vpack.c.bf16 %v275_v28, %v272_v27 }
 0x15f   :  { %v226_v35 = vmul.f32 0.35355338, %v222_v32 }
 0x160   :  { %453 = vrot.lane.b32.xlu0 %v1655_v34, %s1438_s5  ;;  %v337_v36 = vsel %vm332_vm2, %v1655_v34, 0 }
 0x161   :  { %v1661_v37 = vpack.c.bf16 %v226_v35, %v225_v31  ;;  %1123 = vmatpush3.bf16.xpose.msra.mxu1 %v337_v36 }
 0x162   :  { %1134 = vmatprep.subr.bf16.mxu1 %v1436_v0  ;;  %v322_v12 = vpop.f32.mrb[4].mxu0 }
 0x163   :  { %v323_v13 = vadd.f32 %v1050_v11, %v322_v12  ;;  %v1120_v14 = vpop.f32.mrb[5].mxu0 }
 0x164   :  { %450 = vrot.lane.b32.xlu0 %v1661_v37, %s1438_s5  ;;  %v325_v15 = vpop.f32.mrb[6].mxu0 }
 0x165   :  { %v326_v16 = vadd.f32 %v1050_v11, %v325_v15  ;;  %v1121_v17 = vpop.f32.mrb[7].mxu0 }
 0x167   :  { %v1697_v18 = vpack.c.bf16 %v326_v16, %v323_v13 }
 0x168   :  { %1125 = vmatmul.mubr.msk.bf16.vlgmr.msra.gmra.mrb[4].mxu1 %vm332_vm2, %v1661_v37 }
 0x169   :  { %1136 = vmatprep.mubr.msk.bf16.mxu1 %vm1437_vm0, %v1436_v0  ;;  %1129 = vmatpush3.bf16.msra.mxu0 %v1697_v18 }
 0x16a   :  { %1140 = vmatprep.subr.bf16.mxu0 %v1436_v0 }
 0x1d2   :  { %v454_v47 = vpop.permute.xlu0 %453 }
 0x1d3   :  { %v459_v48 = vsel %vm332_vm2, %v454_v47, 0 }
 0x1d4   :  { %1135 = vmatpush3.bf16.xpose.msra.mxu1 %v459_v48 }
 0x1d5   :  { %1146 = vmatprep.subr.bf16.mxu1 %v1436_v0 }
 0x1d6   :  { %v451_v49 = vpop.permute.xlu0 %450 }
 0x1db   :  { %1137 = vmatmul.mubr.msk.bf16.vlgmr.msra.gmra.mrb[8].mxu1 %vm332_vm2, %v451_v49 }
 0x1dc   :  { %1148 = vmatprep.mubr.msk.bf16.mxu1 %vm1437_vm0, %v1436_v0  ;;  %1147 = vmatpush3.bf16.msra.mxu1 %v581_v46 }
 0x1dd   :  { %1158 = vmatprep.subr.bf16.mxu1 %v1436_v0 }
 0x23b   :  { %v373_v51 = vpop.f32.mrb[4].mxu1 }
 0x23c   :  { %v374_v53 = vadd.f32 %v373_v51, %v1680_v50  ;;  %v1126_v54 = vpop.f32.mrb[5].mxu1 }
 0x23d   :  { %v376_v55 = vpop.f32.mrb[6].mxu1 }
 0x23e   :  { %v377_v56 = vadd.f32 %v376_v55, %v1682_v52  ;;  %v1127_v57 = vpop.f32.mrb[7].mxu1  ;;  %v381_v58 = vsel %vm380_vm3, %v374_v53, -inf }
 0x23f   :  { %382 = vmax.xlane.f32.xlu1 %v381_v58  ;;  %v628_v57 = vsel %vm579_vm4, %v169_v44, 0 }
 0x240   :  { %v384_v59 = vsel %vm380_vm3, %v377_v56, -inf }
 0x243   :  { %385 = vmax.xlane.f32.xlu1 %v384_v59 }
 0x2ae   :  { %v495_v60 = vpop.f32.mrb[8].mxu1 }
 0x2af   :  { %v496_v61 = vadd.f32 %v495_v60, %v1680_v50  ;;  %v1138_v62 = vpop.f32.mrb[9].mxu1 }
 0x2b0   :  { %v498_v63 = vpop.f32.mrb[10].mxu1 }
 0x2b1   :  { %v499_v1 = vadd.f32 %v498_v63, %v1682_v52  ;;  %v1139_v2 = vpop.f32.mrb[11].mxu1  ;;  %v502_v3 = vsel %vm380_vm3, %v496_v61, -inf }
 0x2b2   :  { %503 = vmax.xlane.f32.xlu0 %v502_v3 }
 0x2b3   :  { %v505_v4 = vsel %vm380_vm3, %v499_v1, -inf }
 0x2b4   :  { %506 = vmax.xlane.f32.xlu1 %v505_v4 }
 0x2c8   :  { %673 = vrot.lane.b32.xlu0 %v1655_v34, %s1439_s7 }
 0x2cc   :  { %v383_v5 = vpop.xlane.xlu1 %382 }
 0x2cd   :  { %v387_v6 = vsub.f32 %v374_v53, %v383_v5 }
 0x2cf   :  { %v389_v7 = vmul.f32 1.442695, %v387_v6 }
 0x2d0   :  { %v386_v8 = vpop.xlane.xlu1 %385 }
 0x2d1   :  { %1209 = vpow2.f32 %v389_v7  ;;  %v388_v9 = vsub.f32 %v377_v56, %v386_v8 }
 0x2d3   :  { %v391_v10 = vmul.f32 1.442695, %v388_v9 }
 0x2d5   :  { %1211 = vpow2.f32 %v391_v10 }
 0x2db   :  { %v1210_v19 = vpop.eup %1209 }
 0x2dc   :  { %v393_v20 = vsel %vm380_vm3, %v1210_v19, 0.0 }
 0x2dd   :  { %394 = vadd.xlane.f32.xlu1 %v393_v20 }
 0x2df   :  { %v1212_v21 = vpop.eup %1211 }
 0x2e0   :  { %v396_v22 = vsel %vm380_vm3, %v1212_v21, 0.0 }
 0x2e1   :  { %397 = vadd.xlane.f32.xlu1 %v396_v22 }
 0x33f   :  { %v504_v23 = vpop.xlane.xlu0 %503 }
 0x340   :  { %v508_v24 = vsub.f32 %v496_v61, %v504_v23 }
 0x341   :  { %v507_v25 = vpop.xlane.xlu1 %506 }
 0x342   :  { %v510_v26 = vmul.f32 1.442695, %v508_v24  ;;  %v509_v27 = vsub.f32 %v499_v1, %v507_v25 }
 0x343   :  { %v674_v2 = vpop.permute.xlu0 %673 }
 0x344   :  { %1213 = vpow2.f32 %v510_v26  ;;  %v512_v28 = vmul.f32 1.442695, %v509_v27  ;;  %v679_v6 = vsel %vm332_vm2, %v674_v2, 0 }
 0x346   :  { %1215 = vpow2.f32 %v512_v28 }
 0x34e   :  { %v1214_v29 = vpop.eup %1213 }
 0x34f   :  { %v514_v30 = vsel %vm380_vm3, %v1214_v29, 0.0 }
 0x350   :  { %v1216_v31 = vpop.eup %1215  ;;  %515 = vadd.xlane.f32.xlu1 %v514_v30 }
 0x351   :  { %v517_v32 = vsel %vm380_vm3, %v1216_v31, 0.0 }
 0x354   :  { %518 = vadd.xlane.f32.xlu1 %v517_v32 }
 0x365   :  { %526 = vrot.lane.b32.xlu1 %v1697_v18, %s1438_s5 }
 0x369   :  { %671 = vrot.lane.b32.xlu1 %v1661_v37, %s1439_s7 }
 0x36a   :  { %v395_v33 = vpop.xlane.xlu1 %394 }
 0x36b   :  { %1217 = vrcp.f32 %v395_v33 }
 0x36e   :  { %v398_v35 = vpop.xlane.xlu1 %397 }
 0x36f   :  { %1219 = vrcp.f32 %v398_v35 }
 0x375   :  { %v1218_v36 = vpop.eup %1217 }
 0x376   :  { %v401_v39 = vmul.f32 %v1218_v36, %v1210_v19 }
 0x379   :  { %v1220_v38 = vpop.eup %1219 }
 0x37a   :  { %v402_v40 = vmul.f32 %v1220_v38, %v1212_v21 }
 0x37c   :  { %v403_v41 = vpack.c.bf16 %v402_v40, %v401_v39 }
 0x37e   :  { %1131 = vmatmul.mubr.msk.bf16.vlgmr.msra.gmra.mrb[8].mxu0 %vm380_vm3, %v403_v41 }
 0x37f   :  { %1142 = vmatprep.mubr.msk.bf16.mxu0 %vm1437_vm0, %v1436_v0 }
 0x3dd   :  { %v516_v47 = vpop.xlane.xlu1 %515 }
 0x3de   :  { %1221 = vrcp.f32 %v516_v47 }
 0x3e1   :  { %v519_v48 = vpop.xlane.xlu1 %518 }
 0x3e2   :  { %1223 = vrcp.f32 %v519_v48 }
 0x3e5   :  { %v527_v49 = vpop.permute.xlu1 %526 }
 0x3e6   :  { %1141 = vmatpush3.bf16.msra.mxu0 %v527_v49  ;;  %v168_v49 = vld [vmem:[%s1816_s10 + $0x18] sm:$0xff] }
 0x3e7   :  { %1152 = vmatprep.subr.bf16.mxu0 %v1436_v0 }
 0x3e8   :  { %v1222_v51 = vpop.eup %1221 }
 0x3e9   :  { %v522_v54 = vmul.f32 %v1222_v51, %v1214_v29  ;;  %v672_v7 = vpop.permute.xlu1 %671 }
 0x3ec   :  { %v1224_v53 = vpop.eup %1223 }
 0x3ed   :  { %v523_v55 = vmul.f32 %v1224_v53, %v1216_v31 }
 0x3ef   :  { %v524_v56 = vpack.c.bf16 %v523_v55, %v522_v54 }
 0x3f1   :  { %1143 = vmatmul.mubr.msk.bf16.vlgmr.msra.gmra.mrb[12].mxu0 %vm380_vm3, %v524_v56 }
 0x3f2   :  { %1153 = vmatpush3.bf16.msra.mxu0 %v628_v57  ;;  %1154 = vmatprep.mubr.msk.bf16.mxu0 %vm1437_vm0, %v1436_v0 }
 0x3f3   :  { %1164 = vmatprep.subr.bf16.mxu0 %v1436_v0 }
 0x451   :  { %v441_v58 = vpop.f32.mrb[8].mxu0 }
 0x452   :  { %v1132_v59 = vpop.f32.mrb[9].mxu0 }
 0x453   :  { %v444_v60 = vpop.f32.mrb[10].mxu0 }
 0x454   :  { %v448_v61 = vpack.c.bf16 %v444_v60, %v441_v58  ;;  %v1133_v62 = vpop.f32.mrb[11].mxu0 }
 0x456   :  { %1155 = vmatmul.mubr.msk.bf16.vlgmr.msra.gmra.mrb[16].mxu0 %vm332_vm2, %v448_v61 }
 0x457   :  { %1166 = vmatprep.mubr.msk.bf16.mxu0 %vm1437_vm0, %v1436_v0 }
 0x4c4   :  { %v566_v63 = vpop.f32.mrb[12].mxu0 }
 0x4c5   :  { %v1144_v1 = vpop.f32.mrb[13].mxu0 }
 0x4c6   :  { %v569_v3 = vpop.f32.mrb[14].mxu0 }
 0x4c7   :  { %v573_v4 = vpack.c.bf16 %v569_v3, %v566_v63  ;;  %v1145_v5 = vpop.f32.mrb[15].mxu0 }
 0x4c9   :  { %1149 = vmatmul.mubr.msk.bf16.vlgmr.msra.gmra.mrb[12].mxu1 %vm332_vm2, %v573_v4 }
 0x4ca   :  { %1159 = vmatpush3.bf16.xpose.msra.mxu1 %v679_v6  ;;  %1160 = vmatprep.mubr.msk.bf16.mxu1 %vm1437_vm0, %v1436_v0 }
 0x4cb   :  { %1170 = vmatprep.subr.bf16.mxu1 %v1436_v0 }
 0x4d1   :  { %1161 = vmatmul.mubr.msk.bf16.vlgmr.msra.gmra.mrb[16].mxu1 %vm332_vm2, %v672_v7 }
 0x4d2   :  { %1172 = vmatprep.mubr.msk.bf16.mxu1 %vm1437_vm0, %v1436_v0 }
 0x529   :  { %v664_v8 = vpop.f32.mrb[16].mxu0 }
 0x52a   :  { %v1156_v9 = vpop.f32.mrb[17].mxu0 }
 0x52b   :  { %v667_v10 = vpop.f32.mrb[18].mxu0 }
 0x52c   :  { %v1157_v11 = vpop.f32.mrb[19].mxu0 }
 0x59c   :  { %v617_v12 = vpop.f32.mrb[12].mxu1 }
 0x59d   :  { %v1737_v13 = vadd.f32 %v664_v8, %v617_v12  ;;  %v1150_v14 = vpop.f32.mrb[13].mxu1 }
 0x59e   :  { %v620_v15 = vpop.f32.mrb[14].mxu1 }
 0x59f   :  { %v1739_v16 = vadd.f32 %v667_v10, %v620_v15  ;;  %v1151_v17 = vpop.f32.mrb[15].mxu1 }
 0x5a4   :  { %v715_v19 = vpop.f32.mrb[16].mxu1 }
 0x5a5   :  { %v716_v20 = vadd.f32 %v715_v19, %v1680_v50  ;;  %v1162_v21 = vpop.f32.mrb[17].mxu1 }
 0x5a6   :  { %v718_v22 = vpop.f32.mrb[18].mxu1 }
 0x5a7   :  { %v719_v23 = vadd.f32 %v718_v22, %v1682_v52  ;;  %v1163_v24 = vpop.f32.mrb[19].mxu1  ;;  %v722_v25 = vsel %vm380_vm3, %v716_v20, -inf }
 0x5a8   :  { %723 = vmax.xlane.f32.xlu1 %v722_v25 }
 0x5a9   :  { %v725_v26 = vsel %vm380_vm3, %v719_v23, -inf }
 0x5aa   :  { %726 = vmax.xlane.f32.xlu0 %v725_v26 }
 0x5c0   :  { %745 = vrot.lane.b32.xlu0 %v1697_v18, %s1439_s7 }
 0x635   :  { %v724_v27 = vpop.xlane.xlu1 %723 }
 0x636   :  { %v728_v28 = vsub.f32 %v716_v20, %v724_v27 }
 0x637   :  { %v727_v29 = vpop.xlane.xlu0 %726 }
 0x638   :  { %v730_v30 = vmul.f32 1.442695, %v728_v28  ;;  %v729_v31 = vsub.f32 %v719_v23, %v727_v29 }
 0x63a   :  { %1225 = vpow2.f32 %v730_v30  ;;  %v732_v32 = vmul.f32 1.442695, %v729_v31 }
 0x63b   :  { %v746_v33 = vpop.permute.xlu0 %745 }
 0x63c   :  { %1227 = vpow2.f32 %v732_v32  ;;  %1165 = vmatpush3.bf16.msra.mxu0 %v746_v33  ;;  %v1064_v33 = vld [vmem:[%s1817_s11] ss:$0 sm:$0xff] }
 0x63d   :  { %1176 = vmatprep.subr.bf16.mxu0 %v1436_v0 }
 0x644   :  { %v1226_v35 = vpop.eup %1225 }
 0x645   :  { %v734_v36 = vsel %vm380_vm3, %v1226_v35, 0.0 }
 0x646   :  { %v1228_v38 = vpop.eup %1227  ;;  %735 = vadd.xlane.f32.xlu1 %v734_v36 }
 0x647   :  { %v737_v39 = vsel %vm380_vm3, %v1228_v38, 0.0 }
 0x64a   :  { %738 = vadd.xlane.f32.xlu1 %v737_v39 }
 0x65b   :  { %844 = vrot.lane.b32.xlu1 %v1655_v34, %s1440_s2 }
 0x65f   :  { %842 = vrot.lane.b32.xlu1 %v1661_v37, %s1440_s2  ;;  %v167_v37 = vld [vmem:[%s1816_s10 + $0x10] sm:$0xff] }
 0x660   :  { %v170_v51 = vpack.c.bf16 %v168_v49, %v167_v37 }
 0x662   :  { %v797_v53 = vsel %vm579_vm4, %v170_v51, 0  ;;  %v965_v12 = vrot.slane %v170_v51, 4 }
 0x663   :  { %1171 = vmatpush3.bf16.msra.mxu1 %v797_v53 }
 0x664   :  { %1182 = vmatprep.subr.bf16.mxu1 %v1436_v0 }
 0x6d3   :  { %v736_v40 = vpop.xlane.xlu1 %735 }
 0x6d4   :  { %1229 = vrcp.f32 %v736_v40 }
 0x6d7   :  { %v739_v41 = vpop.xlane.xlu1 %738 }
 0x6d8   :  { %1231 = vrcp.f32 %v739_v41 }
 0x6db   :  { %v845_v46 = vpop.permute.xlu1 %844 }
 0x6dc   :  { %v850_v48 = vsel %vm332_vm2, %v845_v46, 0 }
 0x6de   :  { %v1230_v42 = vpop.eup %1229 }
 0x6df   :  { %v742_v44 = vmul.f32 %v1230_v42, %v1226_v35  ;;  %v843_v34 = vpop.permute.xlu1 %842 }
 0x6e2   :  { %v1232_v43 = vpop.eup %1231 }
 0x6e3   :  { %v743_v45 = vmul.f32 %v1232_v43, %v1228_v38 }
 0x6e5   :  { %v744_v47 = vpack.c.bf16 %v743_v45, %v742_v44 }
 0x6e7   :  { %1167 = vmatmul.mubr.msk.bf16.vlgmr.msra.gmra.mrb[20].mxu0 %vm380_vm3, %v744_v47 }
 0x6e8   :  { %1177 = vmatpush3.bf16.xpose.msra.mxu0 %v850_v48  ;;  %1178 = vmatprep.mubr.msk.bf16.mxu0 %vm1437_vm0, %v1436_v0 }
 0x6e9   :  { %1188 = vmatprep.subr.bf16.mxu0 %v1436_v0 }
 0x6ef   :  { %1179 = vmatmul.mubr.msk.bf16.vlgmr.msra.gmra.mrb[24].mxu0 %vm332_vm2, %v843_v34 }
 0x6f0   :  { %1190 = vmatprep.mubr.msk.bf16.mxu0 %vm1437_vm0, %v1436_v0 }
 0x7ba   :  { %v785_v54 = vpop.f32.mrb[20].mxu0 }
 0x7bb   :  { %v1168_v55 = vpop.f32.mrb[21].mxu0 }
 0x7bc   :  { %v788_v56 = vpop.f32.mrb[22].mxu0 }
 0x7bd   :  { %v792_v57 = vpack.c.bf16 %v788_v56, %v785_v54  ;;  %v1169_v58 = vpop.f32.mrb[23].mxu0 }
 0x7bf   :  { %1173 = vmatmul.mubr.msk.bf16.vlgmr.msra.gmra.mrb[20].mxu1 %vm332_vm2, %v792_v57 }
 0x7c0   :  { %1184 = vmatprep.mubr.msk.bf16.mxu1 %vm1437_vm0, %v1436_v0 }
 0x7c2   :  { %v886_v59 = vpop.f32.mrb[24].mxu0 }
 0x7c3   :  { %v887_v60 = vadd.f32 %v886_v59, %v1680_v50  ;;  %v1180_v61 = vpop.f32.mrb[25].mxu0 }
 0x7c4   :  { %v889_v62 = vpop.f32.mrb[26].mxu0 }
 0x7c5   :  { %v890_v63 = vadd.f32 %v889_v62, %v1682_v52  ;;  %v1181_v1 = vpop.f32.mrb[27].mxu0  ;;  %v893_v2 = vsel %vm380_vm3, %v887_v60, -inf }
 0x7c6   :  { %894 = vmax.xlane.f32.xlu0 %v893_v2 }
 0x7c7   :  { %v896_v3 = vsel %vm380_vm3, %v890_v63, -inf }
 0x7c8   :  { %897 = vmax.xlane.f32.xlu1 %v896_v3 }
 0x7d9   :  { %916 = vrot.lane.b32.xlu1 %v1697_v18, %s1440_s2  ;;  %v970_v18 = vsel %vm579_vm4, %v965_v12, 0 }
 0x7da   :  { %1189 = vmatpush3.bf16.msra.mxu0 %v970_v18 }
 0x853   :  { %v895_v4 = vpop.xlane.xlu0 %894 }
 0x854   :  { %v899_v5 = vsub.f32 %v887_v60, %v895_v4 }
 0x855   :  { %v898_v0 = vpop.xlane.xlu1 %897 }
 0x856   :  { %v901_v6 = vmul.f32 1.442695, %v899_v5  ;;  %v900_v7 = vsub.f32 %v890_v63, %v898_v0 }
 0x858   :  { %1233 = vpow2.f32 %v901_v6  ;;  %v903_v50 = vmul.f32 1.442695, %v900_v7 }
 0x859   :  { %v917_v8 = vpop.permute.xlu1 %916 }
 0x85a   :  { %1235 = vpow2.f32 %v903_v50  ;;  %1183 = vmatpush3.bf16.msra.mxu1 %v917_v8 }
 0x862   :  { %v1234_v52 = vpop.eup %1233 }
 0x863   :  { %v905_v9 = vsel %vm380_vm3, %v1234_v52, 0.0 }
 0x864   :  { %v1236_v10 = vpop.eup %1235  ;;  %906 = vadd.xlane.f32.xlu0 %v905_v9 }
 0x865   :  { %v908_v11 = vsel %vm380_vm3, %v1236_v10, 0.0 }
 0x868   :  { %909 = vadd.xlane.f32.xlu0 %v908_v11 }
 0x892   :  { %v833_v14 = vpop.f32.mrb[20].mxu1 }
 0x893   :  { %v840_v15 = vadd.f32 %v833_v14, %v1737_v13  ;;  %v1174_v17 = vpop.f32.mrb[21].mxu1 }
 0x894   :  { %v836_v19 = vpop.f32.mrb[22].mxu1 }
 0x895   :  { %v841_v20 = vadd.f32 %v836_v19, %v1739_v16  ;;  %v1175_v21 = vpop.f32.mrb[23].mxu1 }
 0x8f1   :  { %v907_v22 = vpop.xlane.xlu0 %906 }
 0x8f2   :  { %1237 = vrcp.f32 %v907_v22 }
 0x8f5   :  { %v910_v23 = vpop.xlane.xlu0 %909 }
 0x8f6   :  { %1239 = vrcp.f32 %v910_v23 }
 0x8fc   :  { %v1238_v24 = vpop.eup %1237 }
 0x8fd   :  { %v913_v26 = vmul.f32 %v1238_v24, %v1234_v52 }
 0x900   :  { %v1240_v25 = vpop.eup %1239 }
 0x901   :  { %v914_v27 = vmul.f32 %v1240_v25, %v1236_v10 }
 0x903   :  { %v915_v28 = vpack.c.bf16 %v914_v27, %v913_v26 }
 0x905   :  { %1185 = vmatmul.mubr.msk.bf16.vlgmr.msra.gmra.mrb[24].mxu1 %vm380_vm3, %v915_v28 }
 0x9d8   :  { %v956_v29 = vpop.f32.mrb[24].mxu1 }
 0x9d9   :  { %v1186_v30 = vpop.f32.mrb[25].mxu1 }
 0x9da   :  { %v959_v31 = vpop.f32.mrb[26].mxu1 }
 0x9db   :  { %v963_v13 = vpack.c.bf16 %v959_v31, %v956_v29  ;;  %v1187_v32 = vpop.f32.mrb[27].mxu1 }
 0x9dd   :  { %1191 = vmatmul.mubr.msk.bf16.vlgmr.msra.gmra.mrb[28].mxu0 %vm332_vm2, %v963_v13 }
 0xab0   :  { %v1006_v16 = vpop.f32.mrb[28].mxu0 }
 0xab1   :  { %v1013_v35 = vadd.f32 %v1006_v16, %v840_v15  ;;  %v1192_v36 = vpop.f32.mrb[29].mxu0 }
 0xab2   :  { %v1009_v38 = vpop.f32.mrb[30].mxu0 }
 0xab3   :  { %v1022_v39 = vadd.f32 %v1064_v33, %v1013_v35  ;;  %v1014_v40 = vadd.f32 %v1009_v38, %v841_v20  ;;  %v1193_v41 = vpop.f32.mrb[31].mxu0 }
 0xab5   :  { %1024 = vst.msk [vmem:[#allocation14] sm:$0xff] %vm180_vm1, %v1022_v39  ;;  %v1023_v42 = vadd.f32 %v1064_v33, %v1014_v40 }
 0xab7   :  { %1025 = vst.msk [vmem:[#allocation14 + $0x8] sm:$0xff] %vm180_vm1, %v1023_v42 }
 0xab8   :  { %1406 = shalt.err (!%p1403_p4)
}
 0xab9   :  { %s1407_s14 = scalar_lea.hbm %s1818_s12, 256 }
 0xaba   :  { %p1408_p5 = scmp.ne.s32.totalorder %s1818_s12, %s1407_s14  ;;  %p1411_p6 = scmp.lt.u32.totalorder %s1407_s14, %s1818_s12 }
 0xabc   :  { %p1413_p7 = pnand %p1411_p6, %p1408_p5 }
 0xabe   :  { %1416 = shalt.err (!%p1413_p7)
}
 0xabf   :  { %1037 = dma.vmem_to_hbm [thread:$0]  %s1032_s28, 256, %s1818_s12, [#allocation4], %s1429_s15, %s1429_s15, %s1430_s16  }
 0xac0   :  { %1425 = dma.done.wait [#allocation4], 256  }
 0xac1   :  { %1426 = vsyncadd [#allocation4], 4294967040 }
 0xac2   :  { %1041 = vsyncpa [#allocation3], 1 }
 0xac3   :  { %1042 = vsyncpa [#allocation6], 1 }
 0xac4   :  { %1043 = vsyncpa [#allocation9], 1 }
 0xac5   :  { %1044 = vsyncpa [#allocation12], 1 }
 0xac6   :  { %1045 = vsyncpa [#allocation4], 1 }

</bundles_post_ra>
